<compile_context>
chip_gen: v5e
topology: v5e:2x2
jax: 0.10.0
libtpu: 0.0.40
codegen_flags: <defaults>
</compile_context>

<pallas_src>
import jax
import jax.numpy as jnp
from jax.experimental import pallas as pl
from jax.experimental.pallas import tpu as pltpu

_MIB = 1024 * 1024


# ---------------------------------------------------------------------------
# Kernels
# ---------------------------------------------------------------------------
def _bce_mean_masked_kernel(x_ref, t_ref, m_ref, o_ref):
    # All compute in f32 for stability (matches torch's float32 math).
    x = x_ref[...].astype(jnp.float32)
    t = t_ref[...].astype(jnp.float32)
    m = m_ref[...].astype(jnp.float32)
    # Numerically stable BCE-with-logits (same formulation torch uses):
    #   loss = max(x, 0) - x*t + log(1 + exp(-|x|))
    loss = jnp.maximum(x, 0.0) - x * t + jnp.log1p(jnp.exp(-jnp.abs(x)))
    inv_l = jnp.float32(1.0 / x.shape[1])          # static; mean divides by L
    means = jnp.sum(loss * m, axis=1) * inv_l      # (tb,)
    o_ref[...] = means[None, :]                    # lane-dense (1, tb) store


def _bce_mean_kernel(x_ref, t_ref, o_ref):
    # mask=None path: two input streams only (~33% less HBM traffic).
    x = x_ref[...].astype(jnp.float32)
    t = t_ref[...].astype(jnp.float32)
    loss = jnp.maximum(x, 0.0) - x * t + jnp.log1p(jnp.exp(-jnp.abs(x)))
    inv_l = jnp.float32(1.0 / x.shape[1])
    means = jnp.sum(loss, axis=1) * inv_l
    o_ref[...] = means[None, :]


# ---------------------------------------------------------------------------
# Sizing helpers
# ---------------------------------------------------------------------------
def _floor_multiple(x, m):
    return (x // m) * m


def _vmem_capacity_bytes():
    """Best-effort per-generation VMEM capacity; conservative fallback (v7x)."""
    try:
        info = pltpu.get_tpu_info()
        cap = getattr(info, "vmem_capacity_bytes", None)
        if cap:
            return int(cap)
    except Exception:
        pass
    return 64 * _MIB


def _pick_block_rows(B, bytes_per_row, max_block_bytes):
    """Rows per grid step (tb), sized by bytes only.

    * B < 256: single full-dim block (always layout-legal, grid of 1).
    * Otherwise: multiple of 128 (satisfies f32/bf16/int8 sublane tiling for
      the inputs and keeps the lane-dense (1, tb) output block legal), capped
      so the grid has >= 2 steps (>= 4 for large B) for megacore sharding.
    """
    if B < 256:
        return B
    rows = max(128, _floor_multiple(max_block_bytes // max(1, bytes_per_row), 128))
    min_steps = 4 if B >= 1024 else 2
    rows = min(rows, max(128, _floor_multiple(B // min_steps, 128)))
    return rows


# ---------------------------------------------------------------------------
# Wrapper
# ---------------------------------------------------------------------------
def sigmoid_bce_loss(inputs, target, mask=None, *, tb=None):
    """Pallas implementation of SigmoidBCELoss.forward.

    inputs, target, (optional) mask: (B, L) arrays. Returns (B,) float32.
    target/mask may be narrow dtypes (int8 / bf16); math is done in f32.
    """
    B, L = inputs.shape
    assert target.shape == (B, L)
    if mask is not None:
        assert mask.shape == (B, L)

    if mask is None:
        kernel = _bce_mean_kernel
        operands = (inputs, target)
    else:
        kernel = _bce_mean_masked_kernel
        operands = (inputs, target, mask)

    bytes_per_row = sum(L * x.dtype.itemsize for x in operands)

    # Per-generation budgets: big blocks on v5e/v6e (128 MiB VMEM), bounded on
    # v7x (64 MiB per TC, but 3.2 TB/s HBM means small blocks lose less).
    vmem_cap = _vmem_capacity_bytes()
    if vmem_cap >= 96 * _MIB:            # v5e / v6e
        max_block_bytes = 16 * _MIB      # total across input streams, per block
        vmem_limit_cap = 96 * _MIB
    else:                                # v7x
        max_block_bytes = 6 * _MIB
        vmem_limit_cap = 40 * _MIB

    if tb is None:
        tb = _pick_block_rows(B, bytes_per_row, max_block_bytes)
    tb = max(1, min(int(tb), B))
    if tb >= B:
        tb = B
        grid_b = 1
    else:
        tb = _floor_multiple(tb, 128)
        if tb < 128:
            tb = B                       # too small to tile legally: one block
        grid_b = pl.cdiv(B, tb)

    b_padded = grid_b * tb               # padded output width (sliced to B)

    in_specs = [pl.BlockSpec((tb, L), lambda i: (i, 0)) for _ in operands]
    out_spec = pl.BlockSpec((1, tb), lambda i: (0, i))   # lane-dense output row

    n_flops_per_elem = 6 if mask is not None else 5
    cost = pl.CostEstimate(
        flops=n_flops_per_elem * B * L,
        transcendentals=2 * B * L,          # exp + log1p per element
        bytes_accessed=sum(x.size * x.dtype.itemsize for x in operands) + B * 4,
    )

    # Double-buffered inputs + (small) resident output + headroom; 32 MiB floor
    # raises v5e's 16 MiB scoped default, cap keeps v7x safely inside 64 MiB.
    block_in_bytes = tb * bytes_per_row
    vmem_limit = min(max(2 * block_in_bytes + b_padded * 4 + 2 * _MIB, 32 * _MIB),
                     vmem_limit_cap)

    out = pl.pallas_call(
        kernel,
        out_shape=jax.ShapeDtypeStruct((1, b_padded), jnp.float32),
        grid_spec=pltpu.PrefetchScalarGridSpec(
            num_scalar_prefetch=0,
            grid=(grid_b,),
            in_specs=in_specs,
            out_specs=out_spec,
        ),
        compiler_params=pltpu.CompilerParams(
            dimension_semantics=("parallel",),
            vmem_limit_bytes=int(vmem_limit),
        ),
        cost_estimate=cost,
    )(*operands)

    # Padded tail rows (B % tb != 0) contain garbage computed on padded input
    # rows; they are sliced away here, so results stay exact.
    return out.reshape(b_padded)[:B]


# ---------------------------------------------------------------------------
# Reference + self-test
# ---------------------------------------------------------------------------
def _reference(inputs, target, mask=None):
    x = inputs.astype(jnp.float32)
    t = target.astype(jnp.float32)
    loss = jnp.maximum(x, 0.0) - x * t + jnp.log1p(jnp.exp(-jnp.abs(x)))
    if mask is not None:
        loss = loss * mask.astype(jnp.float32)
    return loss.mean(axis=1)


if __name__ == "__main__":
    key = jax.random.PRNGKey(0)
    k1, k2, k3, k4 = jax.random.split(key, 4)

    # Small Word2Vec-like shapes: batch x (num_context + noise words).
    B, L = 64, 32
    inputs = jax.random.normal(k1, (B, L), dtype=jnp.float32) * 2.0
    # {0,1}-valued side streams passed narrow (int8) -> less HBM traffic.
    target = (jax.random.uniform(k2, (B, L)) > 0.5).astype(jnp.int8)
    mask = (jax.random.uniform(k3, (B, L)) > 0.25).astype(jnp.int8)

    # Masked path (single full block).
    ref = _reference(inputs, target, mask)
    out = sigmoid_bce_loss(inputs, target, mask)
    jax.block_until_ready(out)
    assert out.shape == (B,)
    assert jnp.allclose(out, ref, atol=1e-5, rtol=1e-5), (out, ref)

    # Unmasked path: dedicated 2-input kernel.
    out_nm = sigmoid_bce_loss(inputs, target)
    jax.block_until_ready(out_nm)
    ref_nm = _reference(inputs, target, None)
    assert jnp.allclose(out_nm, ref_nm, atol=1e-5, rtol=1e-5), (out_nm, ref_nm)

    # Larger batch: tiled multi-step grid (megacore "parallel" axis) with a
    # partial final block (640 % 256 != 0) and lane-dense (1, 256) out blocks.
    B2, L2 = 640, 48
    x2 = jax.random.normal(k4, (B2, L2), dtype=jnp.float32)
    t2 = (jax.random.uniform(k2, (B2, L2)) > 0.5).astype(jnp.int8)
    m2 = (jax.random.uniform(k3, (B2, L2)) > 0.25).astype(jnp.int8)
    ref2 = _reference(x2, t2, m2)
    out2 = sigmoid_bce_loss(x2, t2, m2)
    jax.block_until_ready(out2)
    assert out2.shape == (B2,)
    assert jnp.allclose(out2, ref2, atol=1e-5, rtol=1e-5), (out2, ref2)

    print("KERNEL_OK")
</pallas_src>

<mosaic_0001>
module attributes {stable_mosaic.version = 11 : i64} {
  func.func @_bce_mean_masked_kernel(%arg0: i32, %arg1: memref<64x32xf32, #tpu.memory_space<vmem>>, %arg2: memref<64x32xi8, #tpu.memory_space<vmem>>, %arg3: memref<64x32xi8, #tpu.memory_space<vmem>>, %arg4: memref<1x64xf32, #tpu.memory_space<vmem>>) attributes {dimension_semantics = [#tpu.dimension_semantics<parallel>], iteration_bounds = array<i64: 1>, scalar_prefetch = 0 : i64, scratch_operands = 0 : i64, tpu.core_type = #tpu.core_type<tc>, window_params = [{transform_indices = @transform_0, window_bounds = array<i64: 64, 32>}, {transform_indices = @transform_1, window_bounds = array<i64: 64, 32>}, {transform_indices = @transform_2, window_bounds = array<i64: 64, 32>}, {transform_indices = @transform_3, window_bounds = array<i64: 1, 64>}]} {
    %c0 = arith.constant 0 : index
    %c0_0 = arith.constant 0 : index
    %0 = vector.load %arg1[%c0, %c0_0] : memref<64x32xf32, #tpu.memory_space<vmem>>, vector<64x32xf32>
    %c0_1 = arith.constant 0 : index
    %c0_2 = arith.constant 0 : index
    %1 = vector.load %arg2[%c0_1, %c0_2] : memref<64x32xi8, #tpu.memory_space<vmem>>, vector<64x32xi8>
    %2 = arith.sitofp %1 : vector<64x32xi8> to vector<64x32xf32>
    %c0_3 = arith.constant 0 : index
    %c0_4 = arith.constant 0 : index
    %3 = vector.load %arg3[%c0_3, %c0_4] : memref<64x32xi8, #tpu.memory_space<vmem>>, vector<64x32xi8>
    %4 = arith.sitofp %3 : vector<64x32xi8> to vector<64x32xf32>
    %cst = arith.constant 0.000000e+00 : f32
    %5 = vector.broadcast %cst : f32 to vector<64x32xf32>
    %6 = arith.maximumf %0, %5 : vector<64x32xf32>
    %7 = arith.mulf %0, %2 : vector<64x32xf32>
    %8 = arith.subf %6, %7 : vector<64x32xf32>
    %9 = math.absf %0 : vector<64x32xf32>
    %cst_5 = arith.constant 0.000000e+00 : f32
    %10 = vector.broadcast %cst_5 : f32 to vector<64x32xf32>
    %11 = arith.subf %10, %9 : vector<64x32xf32>
    %12 = math.exp %11 : vector<64x32xf32>
    %13 = math.log1p %12 : vector<64x32xf32>
    %14 = arith.addf %8, %13 : vector<64x32xf32>
    %15 = arith.mulf %14, %4 : vector<64x32xf32>
    %cst_6 = arith.constant dense<0.000000e+00> : vector<64xf32>
    %16 = vector.multi_reduction <add>, %15, %cst_6 [1] : vector<64x32xf32> to vector<64xf32>
    %cst_7 = arith.constant 3.125000e-02 : f32
    %17 = vector.broadcast %cst_7 : f32 to vector<64xf32>
    %18 = arith.mulf %16, %17 : vector<64xf32>
    %19 = vector.shape_cast %18 : vector<64xf32> to vector<1x64xf32>
    %c0_8 = arith.constant 0 : index
    %c0_9 = arith.constant 0 : index
    %20 = vector.load %arg4[%c0_8, %c0_9] : memref<1x64xf32, #tpu.memory_space<vmem>>, vector<1x64xf32>
    tpu.vector_store %arg4[%c0_8, %c0_9], %19 {strides = array<i32>} : memref<1x64xf32, #tpu.memory_space<vmem>>, vector<1x64xf32>,
    return
  }
  func.func @transform_0(%arg0: i32) -> (i32, i32) {
    %c0_i32 = arith.constant 0 : i32
    %c0_i32_0 = arith.constant 0 : i32
    return %arg0, %c0_i32 : i32, i32
  }
  func.func @transform_1(%arg0: i32) -> (i32, i32) {
    %c0_i32 = arith.constant 0 : i32
    %c0_i32_0 = arith.constant 0 : i32
    return %arg0, %c0_i32 : i32, i32
  }
  func.func @transform_2(%arg0: i32) -> (i32, i32) {
    %c0_i32 = arith.constant 0 : i32
    %c0_i32_0 = arith.constant 0 : i32
    return %arg0, %c0_i32 : i32, i32
  }
  func.func @transform_3(%arg0: i32) -> (i32, i32) {
    %c0_i32 = arith.constant 0 : i32
    %c0_i32_0 = arith.constant 0 : i32
    return %c0_i32, %arg0 : i32, i32
  }
}

</mosaic_0001>

<bundles_post_ra>
// kernel: tpu_custom_call.1
= control target key start
LH: loop header
LB: loop body
LE: loop exit
PB: predicated region body
PF: predicated region fallthrough
CT: control target
= control target key end

     0   :  { %s516_s0 = inlined_call_operand.vmem [shape: f32[64,32], index: 0, kind: input, shape index: {}]   ;;  %s517_s1 = inlined_call_operand.vmem [shape: s8[64,32], index: 1, kind: input, shape index: {}]   ;;  %s518_s2 = inlined_call_operand.vmem [shape: s8[64,32], index: 2, kind: input, shape index: {}]   ;;  %s519_s3 = inlined_call_operand.hbm [shape: f32[1,64], index: 3, kind: output, shape index: {}]  }
   0x1   :  { %v377_v0 = vld [vmem:[%s516_s0] sm:$0xff]  ;;  %v17_v2 = vld [vmem:[%s516_s0 + $0x10] sm:$0xff]  ;;  %v394_v8 = vld [vmem:[%s517_s1 + $0x8] sm:$0xff] }
   0x2   :  { %v83_v1 = vand.u32 2147483647, %v377_v0  ;;  %v386_v3 = vld [vmem:[%s517_s1] sm:$0xff]  ;;  %v85_v4 = vand.u32 2147483647, %v17_v2 }
   0x3   :  { %v19_v6 = vld [vmem:[%s516_s0 + $0x20] sm:$0xff] }
   0x4   :  { %v91_v5 = vsub.f32 0.0, %v83_v1  ;;  %v93_v7 = vsub.f32 0.0, %v85_v4 }
   0x5   :  { %8 = vsyncpa [#allocation3], 0  ;;  %v25_v9 = vunpack.c.0.s8 %v386_v3  ;;  %v400_v10 = vld [vmem:[%s518_s2] sm:$0xff]  ;;  %v27_v12 = vunpack.c.2.s8 %v386_v3  ;;  %v87_v14 = vand.u32 2147483647, %v19_v6  ;;  %v406_v15 = vld [vmem:[%s516_s0 + $0x8] sm:$0xff]  ;;  %v29_v16 = vunpack.c.0.s8 %v394_v8 }
   0x6   :  { %v99_v11 = vmul.f32 1.442695, %v91_v5  ;;  %v103_v13 = vmul.f32 1.442695, %v93_v7  ;;  %v43_v17 = vunpack.c.0.s8 %v400_v10  ;;  %v413_v19 = vld [vmem:[%s516_s0 + $0x18] sm:$0xff]  ;;  %v45_v21 = vunpack.c.2.s8 %v400_v10  ;;  %v419_v22 = vld [vmem:[%s518_s2 + $0x8] sm:$0xff] }
   0x7   :  { %v95_v18 = vsub.f32 0.0, %v87_v14  ;;  %v33_v20 = vcvt.s32.f32 %v25_v9  ;;  %v84_v23 = vand.u32 2147483647, %v406_v15  ;;  %v59_v24 = vmax.f32 %v377_v0, 0.0  ;;  %v436_v53 = vld [vmem:[%s516_s0 + $0x28] sm:$0xff]  ;;  %s285_s10 = sshll.u32 %s519_s3, 4  ;;  %s286_s10 = int_to_ptr.hbm [resolvable:$true] %s285_s10 }
   0x8   :  { %295 = vpow2.f32 %v99_v11  ;;  %v35_v25 = vcvt.s32.f32 %v27_v12  ;;  %v61_v27 = vmax.f32 %v17_v2, 0.0  ;;  %v37_v28 = vcvt.s32.f32 %v29_v16 }
   0x9   :  { %297 = vpow2.f32 %v103_v13  ;;  %v107_v26 = vmul.f32 1.442695, %v95_v18  ;;  %v92_v29 = vsub.f32 0.0, %v84_v23  ;;  %v86_v30 = vand.u32 2147483647, %v413_v19 }
   0xa   :  { %v424_v31 = vcvt.s32.f32 %v43_v17  ;;  %v47_v32 = vunpack.c.0.s8 %v419_v22  ;;  %v26_v33 = vunpack.c.1.s8 %v386_v3  ;;  %v67_v35 = vmul.f32 %v33_v20, %v377_v0 }
   0xb   :  { %299 = vpow2.f32 %v107_v26  ;;  %v429_v36 = vcvt.s32.f32 %v45_v21  ;;  %v101_v37 = vmul.f32 1.442695, %v92_v29  ;;  %v94_v38 = vsub.f32 0.0, %v86_v30 }
   0xc   :  { %v69_v42 = vmul.f32 %v35_v25, %v17_v2  ;;  %v63_v43 = vmax.f32 %v19_v6, 0.0  ;;  %v71_v46 = vmul.f32 %v37_v28, %v19_v6  ;;  %v431_v48 = vcvt.s32.f32 %v47_v32 }
   0xd   :  { %301 = vpow2.f32 %v101_v37  ;;  %v34_v49 = vcvt.s32.f32 %v26_v33  ;;  %v105_v52 = vmul.f32 1.442695, %v94_v38  ;;  %v75_v55 = vsub.f32 %v59_v24, %v67_v35 }
   0xe   :  { %v296_v34 = vpop.eup %295  ;;  %v77_v56 = vsub.f32 %v61_v27, %v69_v42  ;;  %v44_v58 = vunpack.c.1.s8 %v400_v10  ;;  %vm203_vm0 = vcmask 261120   ;;  %v79_v59 = vsub.f32 %v63_v43, %v71_v46 }
   0xf   :  { %v298_v39 = vpop.eup %297  ;;  %v115_v40 = vadd.f32 1.0, %v296_v34  ;;  %v118_v41 = vmul.f32 -0.5, %v296_v34  ;;  %v121_v47 = vand.u32 2147483647, %v296_v34  ;;  %v60_v62 = vmax.f32 %v406_v15, 0.0 }
  0x10   :  { %v133_v44 = vadd.f32 1.0, %v298_v39  ;;  %v136_v45 = vmul.f32 -0.5, %v298_v39  ;;  %v139_v51 = vand.u32 2147483647, %v298_v39  ;;  %v68_v63 = vmul.f32 %v34_v49, %v406_v15 }
  0x11   :  { %303 = vlog2.f32 %v115_v40  ;;  %v119_v50 = vadd.f32 1.0, %v118_v41  ;;  %v300_v54 = vpop.eup %299  ;;  %v28_v0 = vunpack.c.3.s8 %v386_v3  ;;  %v88_v1 = vand.u32 2147483647, %v436_v53 }
  0x12   :  { %305 = vlog2.f32 %v133_v44  ;;  %v137_v57 = vadd.f32 1.0, %v136_v45  ;;  %v151_v60 = vadd.f32 1.0, %v300_v54  ;;  %v154_v61 = vmul.f32 -0.5, %v300_v54 }
  0x13   :  { %307 = vpow2.f32 %v105_v52  ;;  %v302_v2 = vpop.eup %301  ;;  %v120_v4 = vmul.f32 %v296_v34, %v119_v50  ;;  %vm443_vm1 = vcmp.lt.f32.partialorder %v121_v47, 0.0004427343  ;;  %vm447_vm2 = vcmp.lt.f32.partialorder %v139_v51, 0.0004427343 }
  0x14   :  { %309 = vlog2.f32 %v151_v60  ;;  %v138_v9 = vmul.f32 %v298_v39, %v137_v57  ;;  %v155_v11 = vadd.f32 1.0, %v154_v61  ;;  %v124_v12 = vadd.f32 1.0, %v302_v2  ;;  %v464_v39 = vld [vmem:[%s516_s0 + $0x30] sm:$0xff] }
  0x15   :  { %v127_v13 = vmul.f32 -0.5, %v302_v2  ;;  %v157_v15 = vand.u32 2147483647, %v300_v54  ;;  %v62_v16 = vmax.f32 %v413_v19, 0.0  ;;  %v96_v17 = vsub.f32 0.0, %v88_v1 }
  0x16   :  { %311 = vlog2.f32 %v124_v12  ;;  %v36_v20 = vcvt.s32.f32 %v28_v0  ;;  %v30_v21 = vunpack.c.1.s8 %v394_v8  ;;  %v130_v25 = vand.u32 2147483647, %v302_v2 }
  0x17   :  { %v304_v7 = vpop.eup %303  ;;  %v128_v24 = vadd.f32 1.0, %v127_v13  ;;  %v109_v26 = vmul.f32 1.442695, %v96_v17  ;;  %v156_v30 = vmul.f32 %v300_v54, %v155_v11  ;;  %v76_v32 = vsub.f32 %v60_v62, %v68_v63 }
  0x18   :  { %v306_v3 = vpop.eup %305  ;;  %v117_v14 = vmul.f32 0.6931472, %v304_v7  ;;  %vm457_vm3 = vcmp.lt.f32.partialorder %v157_v15, 0.0004427343  ;;  %v70_v42 = vmul.f32 %v36_v20, %v413_v19  ;;  %vm469_vm4 = vcmp.lt.f32.partialorder %v130_v25, 0.0004427343 }
  0x19   :  { %v135_v18 = vmul.f32 0.6931472, %v306_v3  ;;  %v308_v27 = vpop.eup %307  ;;  %313 = vpow2.f32 %v109_v26  ;;  %v129_v44 = vmul.f32 %v302_v2, %v128_v24  ;;  %v480_v19 = vld [vmem:[%s516_s0 + $0x38] sm:$0xff]  ;;  %v38_v62 = vcvt.s32.f32 %v30_v21  ;;  %s353_s0 = smov [#allocation2]  }
  0x1a   :  { %v123_v23 = vsel %vm443_vm1, %v120_v4, %v117_v14  ;;  %v310_v33 = vpop.eup %309  ;;  %v142_v37 = vadd.f32 1.0, %v308_v27  ;;  %v145_v38 = vmul.f32 -0.5, %v308_v27  ;;  %v148_v54 = vand.u32 2147483647, %v308_v27  ;;  %s283_s7 = sshll.u32 %s353_s0, 4  ;;  %s284_s7 = int_to_ptr.vmem [resolvable:$true] %s283_s7 }
  0x1b   :  { %v187_v28 = vadd.f32 %v123_v23, %v75_v55  ;;  %v141_v29 = vsel %vm447_vm2, %v138_v9, %v135_v18  ;;  %v153_v41 = vmul.f32 0.6931472, %v310_v33  ;;  %v52_v55 = vcvt.s32.f32 %v44_v58 }
  0x1c   :  { %v189_v34 = vadd.f32 %v141_v29, %v77_v56  ;;  %315 = vlog2.f32 %v142_v37  ;;  %v312_v46 = vpop.eup %311  ;;  %v146_v50 = vadd.f32 1.0, %v145_v38  ;;  %v46_v56 = vunpack.c.3.s8 %v400_v10 }
  0x1d   :  { %v195_v40 = vmul.f32 %v187_v28, %v424_v31  ;;  %v159_v49 = vsel %vm457_vm3, %v156_v30, %v153_v41  ;;  %v89_v31 = vand.u32 2147483647, %v464_v39  ;;  %v126_v52 = vmul.f32 0.6931472, %v312_v46 }
  0x1e   :  { %v197_v43 = vmul.f32 %v189_v34, %v429_v36  ;;  %v191_v51 = vadd.f32 %v159_v49, %v79_v59  ;;  %v90_v63 = vand.u32 2147483647, %v480_v19  ;;  %v78_v59 = vsub.f32 %v62_v16, %v70_v42 }
  0x1f   :  { %v204_v47 = vsel %vm203_vm0, %v195_v40, 0.0  ;;  %v97_v57 = vsub.f32 0.0, %v89_v31  ;;  %v132_v61 = vsel %vm469_vm4, %v129_v44, %v126_v52  ;;  %v314_v0 = vpop.eup %313  ;;  %v147_v2 = vmul.f32 %v308_v27, %v146_v50 }
  0x20   :  { %205 = vadd.xlane.f32.xlu0 %v204_v47  ;;  %v210_v36 = vsel %vm203_vm0, %v197_v43, 0.0  ;;  %v199_v60 = vmul.f32 %v191_v51, %v431_v48  ;;  %v188_v1 = vadd.f32 %v132_v61, %v76_v32  ;;  %vm491_vm5 = vcmp.lt.f32.partialorder %v148_v54, 0.0004427343 }
  0x21   :  { %211 = vadd.xlane.f32.xlu1 %v210_v36  ;;  %v111_v4 = vmul.f32 1.442695, %v97_v57  ;;  %v160_v10 = vadd.f32 1.0, %v314_v0  ;;  %v163_v48 = vmul.f32 -0.5, %v314_v0  ;;  %v54_v9 = vcvt.s32.f32 %v46_v56 }
  0x22   :  { %v316_v5 = vpop.eup %315  ;;  %v216_v6 = vsel %vm203_vm0, %v199_v60, 0.0  ;;  %v196_v7 = vmul.f32 %v188_v1, %v52_v55  ;;  %v64_v12 = vmax.f32 %v436_v53, 0.0  ;;  %v72_v13 = vmul.f32 %v38_v62, %v436_v53 }
  0x23   :  { %217 = vadd.xlane.f32.xlu2 %v216_v6  ;;  %v144_v11 = vmul.f32 0.6931472, %v316_v5  ;;  %317 = vpow2.f32 %v111_v4  ;;  %v98_v3 = vsub.f32 0.0, %v90_v63  ;;  %v164_v16 = vadd.f32 1.0, %v163_v48 }
  0x24   :  { %319 = vlog2.f32 %v160_v10  ;;  %v207_v14 = vsel %vm203_vm0, %v196_v7, 0.0  ;;  %v31_v17 = vunpack.c.2.s8 %v394_v8  ;;  %v166_v20 = vand.u32 2147483647, %v314_v0 }
  0x25   :  { %v150_v15 = vsel %vm491_vm5, %v147_v2, %v144_v11  ;;  %v113_v21 = vmul.f32 1.442695, %v98_v3  ;;  %v48_v24 = vunpack.c.1.s8 %v419_v22  ;;  %v80_v53 = vsub.f32 %v64_v12, %v72_v13 }
  0x26   :  { %v190_v18 = vadd.f32 %v150_v15, %v78_v59  ;;  %v165_v26 = vmul.f32 %v314_v0, %v164_v16  ;;  %v39_v27 = vcvt.s32.f32 %v31_v17  ;;  %vm167_vm6 = vcmp.lt.f32.partialorder %v166_v20, 0.0004427343 }
  0x27   :  { %321 = vpow2.f32 %v113_v21  ;;  %v32_v34 = vunpack.c.3.s8 %v394_v8  ;;  %v56_v35 = vcvt.s32.f32 %v48_v24  ;;  %v65_v42 = vmax.f32 %v464_v39, 0.0 }
  0x28   :  { %208 = vadd.xlane.f32.xlu0 %v207_v14  ;;  %v198_v23 = vmul.f32 %v190_v18, %v54_v9  ;;  %v73_v43 = vmul.f32 %v39_v27, %v464_v39  ;;  %v49_v50 = vunpack.c.2.s8 %v419_v22  ;;  %v66_v55 = vmax.f32 %v480_v19, 0.0 }
  0x29   :  { %v318_v25 = vpop.eup %317  ;;  %v40_v45 = vcvt.s32.f32 %v32_v34  ;;  %v50_v61 = vunpack.c.3.s8 %v419_v22  ;;  %v244_v22 = vlaneseq  ;;  %vm249_vm9 = vcmask 130112  }
  0x2a   :  { %v320_v28 = vpop.eup %319  ;;  %v213_v29 = vsel %vm203_vm0, %v198_v23, 0.0  ;;  %v169_v30 = vadd.f32 1.0, %v318_v25  ;;  %v172_v32 = vmul.f32 -0.5, %v318_v25  ;;  %v175_v44 = vand.u32 2147483647, %v318_v25 }
  0x2b   :  { %214 = vadd.xlane.f32.xlu1 %v213_v29  ;;  %v162_v33 = vmul.f32 0.6931472, %v320_v28  ;;  %v81_v51 = vsub.f32 %v65_v42, %v73_v43  ;;  %v74_v39 = vmul.f32 %v40_v45, %v480_v19  ;;  %v57_v57 = vcvt.s32.f32 %v49_v50 }
  0x2c   :  { %323 = vlog2.f32 %v169_v30  ;;  %v173_v38 = vadd.f32 1.0, %v172_v32  ;;  %vm176_vm7 = vcmp.lt.f32.partialorder %v175_v44, 0.0004427343  ;;  %v58_v4 = vcvt.s32.f32 %v50_v61 }
  0x2d   :  { %v168_v37 = vsel %vm167_vm6, %v165_v26, %v162_v33  ;;  %v322_v40 = vpop.eup %321  ;;  %v82_v1 = vsub.f32 %v66_v55, %v74_v39  ;;  %v245_v11 = vand.u32 127, %v244_v22  ;;  %vm253_vm10 = vcmask 195712  }
  0x2e   :  { %v192_v41 = vadd.f32 %v168_v37, %v80_v53  ;;  %v178_v46 = vadd.f32 1.0, %v322_v40  ;;  %v181_v47 = vmul.f32 -0.5, %v322_v40  ;;  %v174_v31 = vmul.f32 %v318_v25, %v173_v38 }
  0x2f   :  { %v184_v56 = vand.u32 2147483647, %v322_v40  ;;  %v247_v13 = vadd.s32 4294967288, %v245_v11  ;;  %v251_v17 = vadd.s32 4294967280, %v245_v11  ;;  %v255_v21 = vadd.s32 4294967272, %v245_v11 }
  0x30   :  { %v200_v49 = vmul.f32 %v192_v41, %v56_v35  ;;  %325 = vlog2.f32 %v178_v46  ;;  %v182_v52 = vadd.f32 1.0, %v181_v47  ;;  %v259_v27 = vadd.s32 4294967264, %v245_v11 }
  0x31   :  { %vm185_vm8 = vcmp.lt.f32.partialorder %v184_v56, 0.0004427343  ;;  %vm257_vm11 = vcmask 261312   ;;  %v263_v30 = vadd.s32 4294967256, %v245_v11  ;;  %v267_v33 = vadd.s32 4294967248, %v245_v11 }
  0x32   :  { %v324_v8 = vpop.eup %323  ;;  %v219_v36 = vsel %vm203_vm0, %v200_v49, 0.0  ;;  %v183_v63 = vmul.f32 %v322_v40, %v182_v52  ;;  %vm261_vm12 = vcmask 326912   ;;  %vm265_vm13 = vcmask 392512  }
  0x33   :  { %220 = vadd.xlane.f32.xlu2 %v219_v36  ;;  %v171_v54 = vmul.f32 0.6931472, %v324_v8  ;;  %vm269_vm14 = vcmask 458112   ;;  %v271_v43 = vadd.s32 4294967240, %v245_v11  ;;  %vm273_vm15 = vcmask 523712  }
  0x35   :  { %v177_v60 = vsel %vm176_vm7, %v174_v31, %v171_v54 }
  0x36   :  { %v193_v62 = vadd.f32 %v177_v60, %v81_v51  ;;  %v326_v0 = vpop.eup %325 }
  0x37   :  { %v180_v2 = vmul.f32 0.6931472, %v326_v0 }
  0x38   :  { %v201_v59 = vmul.f32 %v193_v62, %v57_v57 }
  0x39   :  { %v186_v6 = vsel %vm185_vm8, %v183_v63, %v180_v2 }
  0x3a   :  { %v222_v5 = vsel %vm203_vm0, %v201_v59, 0.0  ;;  %v194_v58 = vadd.f32 %v186_v6, %v82_v1 }
  0x3b   :  { %223 = vadd.xlane.f32.xlu0 %v222_v5 }
  0x3c   :  { %v202_v10 = vmul.f32 %v194_v58, %v58_v4 }
  0x3e   :  { %v225_v19 = vsel %vm203_vm0, %v202_v10, 0.0  ;;  %vm276_vm0 = vcmask 516096  }
  0x3f   :  { %226 = vadd.xlane.f32.xlu1 %v225_v19 }
  0x93   :  { %v206_v48 = vpop.xlane.xlu0 %205 }
  0x94   :  { %v212_v7 = vpop.xlane.xlu1 %211  ;;  %v228_v14 = vmul.f32 0.03125, %v206_v48 }
  0x95   :  { %v230_v18 = vmul.f32 0.03125, %v212_v7 }
  0x96   :  { %v218_v12 = vpop.xlane.xlu2 %217  ;;  %v246_v20 = vperm.slane %v228_v14, %v245_v11 }
  0x97   :  { %v252_v25 = vperm.slane %v230_v18, %v251_v17  ;;  %v232_v28 = vmul.f32 0.03125, %v218_v12 }
  0x99   :  { %v260_v37 = vperm.slane %v232_v28, %v259_v27 }
  0x9b   :  { %v209_v9 = vpop.xlane.xlu0 %208 }
  0x9c   :  { %v229_v3 = vmul.f32 0.03125, %v209_v9 }
  0x9e   :  { %v215_v15 = vpop.xlane.xlu1 %214  ;;  %v248_v16 = vperm.slane %v229_v3, %v247_v13 }
  0x9f   :  { %v231_v23 = vmul.f32 0.03125, %v215_v15 }
  0xa0   :  { %v250_v24 = vsel %vm249_vm9, %v248_v16, %v246_v20 }
  0xa1   :  { %v256_v26 = vperm.slane %v231_v23, %v255_v21  ;;  %v254_v29 = vsel %vm253_vm10, %v252_v25, %v250_v24 }
  0xa3   :  { %v258_v34 = vsel %vm257_vm11, %v256_v26, %v254_v29 }
  0xa4   :  { %v262_v41 = vsel %vm261_vm12, %v260_v37, %v258_v34 }
  0xa6   :  { %v221_v53 = vpop.xlane.xlu2 %220 }
  0xa7   :  { %v233_v32 = vmul.f32 0.03125, %v221_v53 }
  0xa9   :  { %v264_v40 = vperm.slane %v233_v32, %v263_v30 }
  0xab   :  { %v266_v45 = vsel %vm265_vm13, %v264_v40, %v262_v41 }
  0xae   :  { %v224_v35 = vpop.xlane.xlu0 %223 }
  0xaf   :  { %v234_v38 = vmul.f32 0.03125, %v224_v35 }
  0xb1   :  { %v268_v42 = vperm.slane %v234_v38, %v267_v33 }
  0xb2   :  { %v227_v44 = vpop.xlane.xlu1 %226 }
  0xb3   :  { %v235_v46 = vmul.f32 0.03125, %v227_v44  ;;  %v270_v47 = vsel %vm269_vm14, %v268_v42, %v266_v45 }
  0xb5   :  { %v272_v49 = vperm.slane %v235_v46, %v271_v43 }
  0xb7   :  { %v274_v50 = vsel %vm273_vm15, %v272_v49, %v270_v47 }
  0xb8   :  { %277 = vst.msk [vmem:[#allocation2] sm:$0x1] %vm276_vm0, %v274_v50 }
  0xb9   :  { %288 = dma.vmem_to_hbm [thread:$0]  %s284_s7, 16, %s286_s10, [#allocation3]  }
  0xba   :  { %351 = dma.done.wait [#allocation3], 16  }
  0xbb   :  { %352 = vsyncadd [#allocation3], 4294967280 }
  0xbc   :  { %293 = vsyncpa [#allocation3], 1 }

</bundles_post_ra>
